<compile_context>
chip_gen: v7x
topology: tpu7x:2x2x1
jax: 0.10.0
libtpu: 0.0.40
codegen_flags: <defaults>
</compile_context>

<pallas_src>
import functools

import jax
import jax.numpy as jnp
from jax import lax
from jax.experimental import pallas as pl
from jax.experimental.pallas import tpu as pltpu


def _pick_block_rows(B, C):
    """Row-block size: multiple of 8, ~4 MiB of f32 per block, capped at 512."""
    bytes_per_row = 4 * C
    budget = 4 * 1024 * 1024
    tb = max(8, (budget // max(bytes_per_row, 1)) // 8 * 8)
    tb = min(tb, 512)
    if B <= tb:
        return B          # single block covering the full batch dim
    return tb


def _make_kernel(B, C, TB, tau, eps=1e-5):
    inv_tau = 1.0 / float(tau)
    neg_inv_c = -1.0 / float(C)

    def kernel(lo_ref, out_ref):
        i = pl.program_id(0)

        x = lo_ref[...].astype(jnp.float32) * jnp.float32(inv_tau)      # (TB, C)

        # Stable softmax pieces (no division needed for the loss).
        m = jnp.max(x, axis=1, keepdims=True)                           # (TB, 1)
        e = jnp.exp(x - m)                                              # (TB, C)  EUP
        s = jnp.sum(e, axis=1, keepdims=True)                           # (TB, 1)

        # log(softmax + eps) = log(e + eps*s) - log(s)
        elem = jnp.log(e + jnp.float32(eps) * s)                        # (TB, C)  EUP
        row = jnp.sum(elem, axis=1, keepdims=True) - jnp.float32(C) * jnp.log(s)
        row_loss = row * jnp.float32(neg_inv_c)                         # (TB, 1)

        if B % TB != 0:
            # Mask rows past the true batch size in the ragged last block.
            row_ids = i * TB + lax.broadcasted_iota(jnp.int32, (TB, 1), 0)
            row_loss = jnp.where(row_ids < B, row_loss, 0.0)

        # Per-block partial sum (final mean/sum reduction happens in the wrapper).
        out_ref[...] = jnp.sum(row_loss, axis=(0, 1), keepdims=True)    # (1, 1)

    return kernel


@functools.partial(jax.jit, static_argnames=("tau", "reduction"))
def neg_uniform_loss(logit, *, tau=1.0, reduction="mean"):
    if reduction not in ("mean", "sum"):
        raise ValueError(f"Invalid reduction: {reduction}")
    B, C = logit.shape
    TB = _pick_block_rows(B, C)
    G = pl.cdiv(B, TB)

    partials = pl.pallas_call(
        _make_kernel(B, C, TB, float(tau)),
        out_shape=jax.ShapeDtypeStruct((G, 1), jnp.float32),
        grid=(G,),
        in_specs=[pl.BlockSpec((TB, C), lambda i: (i, 0))],
        out_specs=pl.BlockSpec((1, 1), lambda i: (i, 0)),
        compiler_params=pltpu.CompilerParams(
            dimension_semantics=("parallel",)),   # independent row blocks -> 2 TCs on v7x
    )(logit)

    total = jnp.sum(partials)
    if reduction == "mean":
        total = total / jnp.float32(B)
    return total


def _reference(logit, tau=1.0, reduction="mean"):
    # Pure-JAX mirror of the PyTorch NegUniformLoss forward.
    C = logit.shape[-1]
    p = jax.nn.softmax(logit / tau, axis=1)
    loss = (-1.0 / C) * jnp.log(p + 1e-5)
    loss = jnp.sum(loss, axis=1)
    return jnp.mean(loss) if reduction == "mean" else jnp.sum(loss)


if __name__ == "__main__":
    key = jax.random.PRNGKey(0)
    B, C = 8, 32
    logit = jax.random.normal(key, (B, C), dtype=jnp.float32) * 3.0

    ok = True
    for tau, reduction in [(1.0, "mean"), (0.5, "sum"), (2.0, "mean")]:
        out = neg_uniform_loss(logit, tau=tau, reduction=reduction)
        out = jax.block_until_ready(out)
        ref = _reference(logit, tau=tau, reduction=reduction)
        if not jnp.allclose(out, ref, atol=1e-5, rtol=1e-5):
            ok = False
            print("MISMATCH", tau, reduction, out, ref)

    if ok:
        print("KERNEL_OK")
</pallas_src>

<mosaic_0001>
module attributes {stable_mosaic.version = 11 : i64} {
  func.func @kernel(%arg0: i32, %arg1: memref<8x32xf32, #tpu.memory_space<vmem>>, %arg2: memref<1x1xf32, #tpu.memory_space<vmem>>) attributes {dimension_semantics = [#tpu.dimension_semantics<parallel>], iteration_bounds = array<i64: 1>, scalar_prefetch = 0 : i64, scratch_operands = 0 : i64, tpu.core_type = #tpu.core_type<tc>, window_params = [{transform_indices = @transform_0, window_bounds = array<i64: 8, 32>}, {transform_indices = @transform_1, window_bounds = array<i64: 1, 1>}]} {
    %c0 = arith.constant 0 : index
    %c0_0 = arith.constant 0 : index
    %0 = vector.load %arg1[%c0, %c0_0] : memref<8x32xf32, #tpu.memory_space<vmem>>, vector<8x32xf32>
    %cst = arith.constant 1.000000e+00 : f32
    %1 = vector.broadcast %cst : f32 to vector<8x32xf32>
    %2 = arith.mulf %0, %1 : vector<8x32xf32>
    %cst_1 = arith.constant dense<0xFF800000> : vector<8xf32>
    %3 = vector.multi_reduction <maximumf>, %2, %cst_1 [1] : vector<8x32xf32> to vector<8xf32>
    %4 = vector.shape_cast %3 : vector<8xf32> to vector<8x1xf32>
    %5 = vector.broadcast %4 : vector<8x1xf32> to vector<8x32xf32>
    %6 = arith.subf %2, %5 : vector<8x32xf32>
    %7 = math.exp %6 : vector<8x32xf32>
    %cst_2 = arith.constant dense<0.000000e+00> : vector<8xf32>
    %8 = vector.multi_reduction <add>, %7, %cst_2 [1] : vector<8x32xf32> to vector<8xf32>
    %9 = vector.shape_cast %8 : vector<8xf32> to vector<8x1xf32>
    %cst_3 = arith.constant 9.99999974E-6 : f32
    %10 = vector.broadcast %cst_3 : f32 to vector<8x1xf32>
    %11 = arith.mulf %10, %9 : vector<8x1xf32>
    %12 = vector.broadcast %11 : vector<8x1xf32> to vector<8x32xf32>
    %13 = arith.addf %7, %12 : vector<8x32xf32>
    %14 = math.log %13 : vector<8x32xf32>
    %cst_4 = arith.constant dense<0.000000e+00> : vector<8xf32>
    %15 = vector.multi_reduction <add>, %14, %cst_4 [1] : vector<8x32xf32> to vector<8xf32>
    %16 = vector.shape_cast %15 : vector<8xf32> to vector<8x1xf32>
    %17 = math.log %9 : vector<8x1xf32>
    %cst_5 = arith.constant 3.200000e+01 : f32
    %18 = vector.broadcast %cst_5 : f32 to vector<8x1xf32>
    %19 = arith.mulf %18, %17 : vector<8x1xf32>
    %20 = arith.subf %16, %19 : vector<8x1xf32>
    %cst_6 = arith.constant -3.125000e-02 : f32
    %21 = vector.broadcast %cst_6 : f32 to vector<8x1xf32>
    %22 = arith.mulf %20, %21 : vector<8x1xf32>
    %23 = vector.shape_cast %22 : vector<8x1xf32> to vector<1x8x1xf32>
    %cst_7 = arith.constant dense<0.000000e+00> : vector<1xf32>
    %24 = vector.multi_reduction <add>, %23, %cst_7 [1, 2] : vector<1x8x1xf32> to vector<1xf32>
    %25 = vector.shape_cast %24 : vector<1xf32> to vector<1x1x1xf32>
    %26 = vector.extract %25[0, 0, 0] : f32 from vector<1x1x1xf32>
    %27 = vector.broadcast %26 : f32 to vector<1x1xf32>
    %c0_8 = arith.constant 0 : index
    %c0_9 = arith.constant 0 : index
    %28 = vector.load %arg2[%c0_8, %c0_9] : memref<1x1xf32, #tpu.memory_space<vmem>>, vector<1x1xf32>
    tpu.vector_store %arg2[%c0_8, %c0_9], %27 {strides = array<i32>} : memref<1x1xf32, #tpu.memory_space<vmem>>, vector<1x1xf32>,
    return
  }
  func.func @transform_0(%arg0: i32) -> (i32, i32) {
    %c0_i32 = arith.constant 0 : i32
    %c0_i32_0 = arith.constant 0 : i32
    return %arg0, %c0_i32 : i32, i32
  }
  func.func @transform_1(%arg0: i32) -> (i32, i32) {
    %c0_i32 = arith.constant 0 : i32
    %c0_i32_0 = arith.constant 0 : i32
    return %arg0, %c0_i32 : i32, i32
  }
}

</mosaic_0001>

<bundles_post_ra>
// kernel: neg_uniform_loss.1
= control target key start
LH: loop header
LB: loop body
LE: loop exit
PB: predicated region body
PF: predicated region fallthrough
CT: control target
= control target key end

     0   :  { %6 = vsyncpa [#allocation3], 0  ;;  %s170_s0 = inlined_call_operand.hbm [shape: f32[8,32], index: 0, kind: input, shape index: {}]   ;;  %s171_s1 = inlined_call_operand.hbm [shape: f32[1,1], index: 1, kind: output, shape index: {}]  }
   0x1   :  { %7 = vsyncpa [#allocation4], 0  ;;  %s131_s6 = smov [#allocation2]   ;;  %s83_s10 = scalar_lea.hbm %s170_s0, 128 }
   0x2   :  { %s14_s7 = sshll.u32 %s131_s6, 4  ;;  %p84_p0 = scmp.ne.s32.totalorder %s170_s0, %s83_s10  ;;  %s15_s7 = int_to_ptr.vmem [resolvable:$true] %s14_s7 }
   0x3   :  { %p87_p1 = scmp.lt.u32.totalorder %s83_s10, %s170_s0 }
   0x5   :  { %p89_p2 = pnand %p87_p1, %p84_p0 }
   0x7   :  { %92 = shalt.err (!%p89_p2)
}
   0x8   :  { %s93_s15 = scalar_lea.vmem %s15_s7, 128  ;;  %p98_p4 = scmp.lt.s32.totalorder %s15_s7, %s15_s7 }
   0x9   :  { %p94_p3 = scmp.ne.s32.totalorder %s15_s7, %s93_s15  ;;  %p99_p5 = scmp.lt.s32.totalorder %s93_s15, %s93_s15 }
   0xb   :  { %p100_p6 = por %p99_p5, %p98_p4 }
   0xd   :  { %p101_p7 = pnand %p100_p6, %p94_p3 }
   0xf   :  { %104 = shalt.err (!%p101_p7)
}
  0x10   :  { %17 = dma.hbm_to_vmem [thread:$0]  %s170_s0, 128, %s15_s7, [#allocation3]  }
  0x11   :  { %127 = dma.done.wait [#allocation3], 128  }
  0x12   :  { %128 = vsyncadd [#allocation3], 4294967168  ;;  %vm22_vm0 = vcmask 261120   ;;  %v21_v0 = vld [vmem:[#allocation2] sm:$0xff]  ;;  %vm44_vm1 = vcmask 7168   ;;  %s132_s0 = smov [#allocation5]  }
  0x13   :  { %v23_v1 = vsel %vm22_vm0, %v21_v0, -inf  ;;  %s64_s18 = sshll.u32 %s132_s0, 4  ;;  %vm56_vm2 = vcmask 0   ;;  %s65_s18 = int_to_ptr.vmem [resolvable:$true] %s64_s18 }
  0x14   :  { %24 = vmax.xlane.f32.xlu0 %v23_v1  ;;  %s105_s20 = scalar_lea.vmem %s65_s18, 16  ;;  %s109_s21 = scalar_lea.vmem %s65_s18, 32 }
  0x15   :  { %p106_p8 = scmp.ne.s32.totalorder %s65_s18, %s105_s20  ;;  %p110_p9 = scmp.lt.s32.totalorder %s65_s18, %s65_s18 }
  0x16   :  { %p111_p10 = scmp.lt.s32.totalorder %s109_s21, %s105_s20 }
  0x18   :  { %p112_p11 = por %p111_p10, %p110_p9 }
  0x1a   :  { %p113_p12 = pnand %p112_p11, %p106_p8 }
  0xa1   :  { %v25_v2 = vpop.xlane.xlu0 %24 }
  0xa2   :  { %v26_v3 = vsub.f32 %v21_v0, %v25_v2 }
  0xa4   :  { %v27_v4 = vmul.f32 1.442695, %v26_v3 }
  0xa6   :  { %77 = vpow2.f32 %v27_v4 }
  0xb0   :  { %v78_v5 = vpop.eup %77 }
  0xb1   :  { %v29_v6 = vsel %vm22_vm0, %v78_v5, 0.0 }
  0xb2   :  { %30 = vadd.xlane.f32.xlu0 %v29_v6 }
 0x13f   :  { %v31_v7 = vpop.xlane.xlu0 %30 }
 0x140   :  { %v32_v8 = vmul.f32 1e-05, %v31_v7 }
 0x142   :  { %v33_v9 = vadd.f32 %v78_v5, %v32_v8 }
 0x144   :  { %79 = vlog2.f32 %v33_v9 }
 0x145   :  { %81 = vlog2.f32 %v31_v7 }
 0x14e   :  { %v80_v10 = vpop.eup %79 }
 0x14f   :  { %v35_v11 = vmul.f32 0.6931472, %v80_v10  ;;  %v82_v13 = vpop.eup %81 }
 0x150   :  { %v40_v14 = vmul.f32 0.6931472, %v82_v13 }
 0x151   :  { %v36_v12 = vsel %vm22_vm0, %v35_v11, 0.0 }
 0x152   :  { %37 = vadd.xlane.f32.xlu1 %v36_v12  ;;  %v41_v15 = vmul.f32 32.0, %v40_v14 }
 0x1df   :  { %v38_v16 = vpop.xlane.xlu1 %37 }
 0x1e0   :  { %v42_v17 = vsub.f32 %v38_v16, %v41_v15 }
 0x1e2   :  { %v43_v18 = vmul.f32 -0.03125, %v42_v17 }
 0x1e4   :  { %v45_v19 = vsel %vm44_vm1, %v43_v18, 0.0 }
 0x1e5   :  { %46 = vadd.xlane.f32.xlu1 %v45_v19 }
 0x272   :  { %v47_v20 = vpop.xlane.xlu1 %46 }
 0x273   :  { %v48_v21 = vrot.slane %v47_v20, 4 }
 0x275   :  { %v49_v22 = vadd.f32 %v48_v21, %v47_v20 }
 0x277   :  { %v50_v23 = vrot.slane %v49_v22, 2 }
 0x279   :  { %v51_v24 = vadd.f32 %v50_v23, %v49_v22 }
 0x27b   :  { %v52_v25 = vrot.slane %v51_v24, 1 }
 0x27d   :  { %v53_v26 = vadd.f32 %v52_v25, %v51_v24 }
 0x27f   :  { %73 = vpush %v53_v26 }
 0x2b0   :  { %s74_s19 = spop %73 }
 0x2b1   :  { %v55_v27 = vstv %s74_s19 }
 0x2b2   :  { %57 = vst.msk [vmem:[#allocation5] sm:$0x1] %vm56_vm2, %v55_v27 }
 0x2b3   :  { %116 = shalt.err (!%p113_p12)
}
 0x2b4   :  { %s117_s24 = scalar_lea.hbm %s171_s1, 16 }
 0x2b5   :  { %p118_p13 = scmp.ne.s32.totalorder %s171_s1, %s117_s24  ;;  %p121_p0 = scmp.lt.u32.totalorder %s117_s24, %s171_s1 }
 0x2b7   :  { %p123_p1 = pnand %p121_p0, %p118_p13 }
 0x2b9   :  { %126 = shalt.err (!%p123_p1)
}
 0x2ba   :  { %67 = dma.vmem_to_hbm [thread:$0]  %s65_s18, 16, %s171_s1, [#allocation4]  }
 0x2bb   :  { %129 = dma.done.wait [#allocation4], 16  }
 0x2bc   :  { %130 = vsyncadd [#allocation4], 4294967280 }
 0x2bd   :  { %71 = vsyncpa [#allocation3], 1 }
 0x2be   :  { %72 = vsyncpa [#allocation4], 1 }

</bundles_post_ra>
